<compile_context>
chip_gen: v5e
topology: v5e:2x2
jax: 0.10.0
libtpu: 0.0.40
codegen_flags: <defaults>
</compile_context>

<pallas_src>
import jax
import jax.numpy as jnp
from jax.experimental import pallas as pl
from jax.experimental.pallas import tpu as pltpu

# ---- packed-slab row layout (all multiples of 8 sublanes, 128 lanes wide) -------
_R_W1 = 0      # rows   0:8    W1  (8,128)   [0:4, 0:48]  = [wl1 | wr1]
_R_W2 = 8      # rows   8:136  W2  (128,128) block-diag: [0:16,0:8]=wl2, [16:48,8:24]=wr2
_R_W3 = 136    # rows 136:264  W3  (128,128) [0:24, 0:16] = wo1
_R_W4 = 264    # rows 264:392  W4  (128,128) [0:16, 0:3]  = wo2
_R_B = 392     # rows 392:396  biases b1,b2,b3,b4 (one row each; b4 padded with -1e30)
_SLAB_ROWS = 400
_NEG = -1e30   # logit pad value -> exp() underflows to 0 in the softmax


def ann_kernel(x_ref, slab_ref, out_ref):
    x = x_ref[...]                                   # (TB, 8)  (features padded 4->8)

    w1 = slab_ref[_R_W1:_R_W1 + 8, :]                # (8, 128)
    w2 = slab_ref[_R_W2:_R_W2 + 128, :]              # (128, 128)
    w3 = slab_ref[_R_W3:_R_W3 + 128, :]              # (128, 128)
    w4 = slab_ref[_R_W4:_R_W4 + 128, :]              # (128, 128)
    b1 = slab_ref[_R_B + 0:_R_B + 1, :]              # (1, 128)
    b2 = slab_ref[_R_B + 1:_R_B + 2, :]
    b3 = slab_ref[_R_B + 2:_R_B + 3, :]
    b4 = slab_ref[_R_B + 3:_R_B + 4, :]              # pad lanes hold -1e30

    # fused LEFT|RIGHT first layer + ReLU            (pad lanes stay exactly 0)
    h = jnp.dot(x, w1, preferred_element_type=jnp.float32) + b1
    h = jnp.maximum(h, 0.0)
    # fused block-diagonal second layer + ReLU  ->  this IS torch.cat(LEFT, RIGHT)
    h = jnp.dot(h.astype(w2.dtype), w2, preferred_element_type=jnp.float32) + b2
    h = jnp.maximum(h, 0.0)
    # OUT layer: Linear(24->16) + ReLU
    h = jnp.dot(h.astype(w3.dtype), w3, preferred_element_type=jnp.float32) + b3
    h = jnp.maximum(h, 0.0)
    # Linear(16->3); pad lanes get -1e30 bias so softmax ignores them
    logits = jnp.dot(h.astype(w4.dtype), w4, preferred_element_type=jnp.float32) + b4

    # Numerically exact softmax (pad lanes contribute exp(-1e30 - m) == 0).
    m = jnp.max(logits, axis=-1, keepdims=True)
    e = jnp.exp(logits - m)
    denom = jnp.sum(e, axis=-1, keepdims=True)
    out_ref[...] = (e / denom).astype(out_ref.dtype)  # lane-dense (TB,128) store


def _round_up(n, m):
    return ((n + m - 1) // m) * m


def pack_params(p, dtype=jnp.float32):
    """Fuse LEFT/RIGHT branches and pack all weights+biases into one (400,128) slab."""
    w1 = jnp.concatenate([p["wl1"], p["wr1"]], axis=1)          # (4, 48)
    b1 = jnp.concatenate([p["bl1"], p["br1"]], axis=1)          # (1, 48)
    w2 = jnp.zeros((48, 24), jnp.float32)                       # block diagonal
    w2 = w2.at[0:16, 0:8].set(p["wl2"])
    w2 = w2.at[16:48, 8:24].set(p["wr2"])
    b2 = jnp.concatenate([p["bl2"], p["br2"]], axis=1)          # (1, 24)

    slab = jnp.zeros((_SLAB_ROWS, 128), jnp.float32)
    slab = slab.at[_R_W1:_R_W1 + 4, 0:48].set(w1)
    slab = slab.at[_R_W2:_R_W2 + 48, 0:24].set(w2)
    slab = slab.at[_R_W3:_R_W3 + 24, 0:16].set(p["wo1"])
    slab = slab.at[_R_W4:_R_W4 + 16, 0:3].set(p["wo2"])
    slab = slab.at[_R_B + 0, 0:48].set(b1[0])
    slab = slab.at[_R_B + 1, 0:24].set(b2[0])
    slab = slab.at[_R_B + 2, 0:16].set(p["bo1"][0])
    slab = slab.at[_R_B + 3, :].set(jnp.full((128,), _NEG, jnp.float32))
    slab = slab.at[_R_B + 3, 0:3].set(p["bo2"][0])
    return slab.astype(dtype)


def ann_forward(x, params, *, tile_b=1024, compute_dtype=jnp.float32):
    """x: (B, 4) float32. Returns (B, 3) softmax probabilities.

    compute_dtype=jnp.bfloat16 halves DMA bytes of the batch stream for large-batch
    serving (accumulation stays f32); default f32 for exact parity with the reference.
    """
    B = x.shape[0]
    slab = pack_params(params, compute_dtype)

    tb = min(int(tile_b), _round_up(B, 8))          # batch tile, multiple of 8
    B_pad = _round_up(B, tb)
    # pad features 4 -> 8 (sublane-aligned K for the first matmul) and batch -> B_pad
    x_p = jnp.pad(x.astype(compute_dtype), ((0, B_pad - B), (0, 4)))

    out = pl.pallas_call(
        ann_kernel,
        out_shape=jax.ShapeDtypeStruct((B_pad, 128), jnp.float32),
        grid_spec=pltpu.PrefetchScalarGridSpec(
            num_scalar_prefetch=0,
            grid=(B_pad // tb,),
            in_specs=[
                pl.BlockSpec((tb, 8), lambda i: (i, 0)),               # batch stream
                pl.BlockSpec((_SLAB_ROWS, 128), lambda i: (0, 0)),     # resident slab
            ],
            out_specs=pl.BlockSpec((tb, 128), lambda i: (i, 0)),       # lane-dense out
        ),
        compiler_params=pltpu.CompilerParams(
            dimension_semantics=("parallel",)),     # v7x: shard batch over both TCs
    )(x_p, slab)
    return out[:B, :3]


def init_params(key):
    """Deterministic init matching the PyTorch layer shapes.
    nn.Linear(in, out) weights (out, in) are stored transposed as (in, out); bias (1, out)."""
    def linear(key, fan_in, fan_out):
        kw, kb = jax.random.split(key)
        bound = 1.0 / jnp.sqrt(fan_in)
        w = jax.random.uniform(kw, (fan_in, fan_out), jnp.float32, -bound, bound)
        b = jax.random.uniform(kb, (1, fan_out), jnp.float32, -bound, bound)
        return w, b

    keys = jax.random.split(key, 6)
    p = {}
    p["wl1"], p["bl1"] = linear(keys[0], 4, 16)
    p["wl2"], p["bl2"] = linear(keys[1], 16, 8)
    p["wr1"], p["br1"] = linear(keys[2], 4, 32)
    p["wr2"], p["br2"] = linear(keys[3], 32, 16)
    p["wo1"], p["bo1"] = linear(keys[4], 24, 16)
    p["wo2"], p["bo2"] = linear(keys[5], 16, 3)
    return p


def reference_forward(x, p):
    """Pure-JAX reference on the UN-fused parameters (matches the PyTorch forward)."""
    l = jnp.maximum(x @ p["wl1"] + p["bl1"], 0.0)
    l = jnp.maximum(l @ p["wl2"] + p["bl2"], 0.0)
    r = jnp.maximum(x @ p["wr1"] + p["br1"], 0.0)
    r = jnp.maximum(r @ p["wr2"] + p["br2"], 0.0)
    cat = jnp.concatenate([l, r], axis=-1)
    h = jnp.maximum(cat @ p["wo1"] + p["bo1"], 0.0)
    logits = h @ p["wo2"] + p["bo2"]
    return jax.nn.softmax(logits, axis=-1)


if __name__ == "__main__":
    key = jax.random.PRNGKey(0)
    k_x, k_p = jax.random.split(key)
    params = init_params(k_p)

    # Small case (single grid step).
    B = 8
    x = jax.random.normal(k_x, (B, 4), dtype=jnp.float32)
    out = jax.block_until_ready(ann_forward(x, params))
    ref = reference_forward(x, params)
    assert out.shape == (B, 3)
    assert jnp.allclose(out, ref, atol=1e-3, rtol=1e-3)
    # exact softmax divide -> probabilities sum to 1 to float rounding
    assert jnp.allclose(jnp.sum(out, axis=-1), jnp.ones((B,)), atol=1e-3)

    # Larger, non-multiple-of-tile case (exercises grid > 1 and batch padding).
    B2 = 300
    x2 = jax.random.normal(jax.random.PRNGKey(7), (B2, 4), dtype=jnp.float32)
    out2 = jax.block_until_ready(ann_forward(x2, params, tile_b=128))
    ref2 = reference_forward(x2, params)
    assert out2.shape == (B2, 3)
    assert jnp.allclose(out2, ref2, atol=1e-3, rtol=1e-3)
    assert jnp.allclose(jnp.sum(out2, axis=-1), jnp.ones((B2,)), atol=1e-3)

    print("KERNEL_OK")
</pallas_src>

<mosaic_0001>
module attributes {stable_mosaic.version = 11 : i64} {
  func.func @ann_kernel(%arg0: i32, %arg1: memref<8x8xf32, #tpu.memory_space<vmem>>, %arg2: memref<400x128xf32, #tpu.memory_space<vmem>>, %arg3: memref<8x128xf32, #tpu.memory_space<vmem>>) attributes {dimension_semantics = [#tpu.dimension_semantics<parallel>], iteration_bounds = array<i64: 1>, scalar_prefetch = 0 : i64, scratch_operands = 0 : i64, tpu.core_type = #tpu.core_type<tc>, window_params = [{transform_indices = @transform_0, window_bounds = array<i64: 8, 8>}, {pipeline_mode = #tpu.pipeline_mode<synchronous>, transform_indices = @transform_1, window_bounds = array<i64: 400, 128>}, {transform_indices = @transform_2, window_bounds = array<i64: 8, 128>}]} {
    %c0 = arith.constant 0 : index
    %c0_0 = arith.constant 0 : index
    %0 = vector.load %arg1[%c0, %c0_0] : memref<8x8xf32, #tpu.memory_space<vmem>>, vector<8x8xf32>
    %c0_1 = arith.constant 0 : index
    %c0_2 = arith.constant 0 : index
    %1 = vector.load %arg2[%c0_1, %c0_2] : memref<400x128xf32, #tpu.memory_space<vmem>>, vector<8x128xf32>
    %c8 = arith.constant 8 : index
    %c0_3 = arith.constant 0 : index
    %2 = vector.load %arg2[%c8, %c0_3] : memref<400x128xf32, #tpu.memory_space<vmem>>, vector<128x128xf32>
    %c136 = arith.constant 136 : index
    %c0_4 = arith.constant 0 : index
    %3 = vector.load %arg2[%c136, %c0_4] : memref<400x128xf32, #tpu.memory_space<vmem>>, vector<128x128xf32>
    %c264 = arith.constant 264 : index
    %c0_5 = arith.constant 0 : index
    %4 = vector.load %arg2[%c264, %c0_5] : memref<400x128xf32, #tpu.memory_space<vmem>>, vector<128x128xf32>
    %c392 = arith.constant 392 : index
    %c0_6 = arith.constant 0 : index
    %5 = vector.load %arg2[%c392, %c0_6] : memref<400x128xf32, #tpu.memory_space<vmem>>, vector<1x128xf32>
    %c393 = arith.constant 393 : index
    %c0_7 = arith.constant 0 : index
    %6 = vector.load %arg2[%c393, %c0_7] : memref<400x128xf32, #tpu.memory_space<vmem>>, vector<1x128xf32>
    %c394 = arith.constant 394 : index
    %c0_8 = arith.constant 0 : index
    %7 = vector.load %arg2[%c394, %c0_8] : memref<400x128xf32, #tpu.memory_space<vmem>>, vector<1x128xf32>
    %c395 = arith.constant 395 : index
    %c0_9 = arith.constant 0 : index
    %8 = vector.load %arg2[%c395, %c0_9] : memref<400x128xf32, #tpu.memory_space<vmem>>, vector<1x128xf32>
    %cst = arith.constant dense<0.000000e+00> : vector<8x128xf32>
    %9 = tpu.matmul %0, %1, %cst {dimension_numbers = #tpu.dot_dimension_numbers<[1], [0], [0], [1], [0, 0, 1, 1], [], []>} : vector<8x8xf32>, vector<8x128xf32>, vector<8x128xf32> -> vector<8x128xf32>
    %10 = vector.broadcast %5 : vector<1x128xf32> to vector<8x128xf32>
    %11 = arith.addf %9, %10 : vector<8x128xf32>
    %cst_10 = arith.constant 0.000000e+00 : f32
    %12 = vector.broadcast %cst_10 : f32 to vector<8x128xf32>
    %13 = arith.maximumf %11, %12 : vector<8x128xf32>
    %cst_11 = arith.constant dense<0.000000e+00> : vector<8x128xf32>
    %14 = tpu.matmul %13, %2, %cst_11 {dimension_numbers = #tpu.dot_dimension_numbers<[1], [0], [0], [1], [0, 0, 1, 1], [], []>} : vector<8x128xf32>, vector<128x128xf32>, vector<8x128xf32> -> vector<8x128xf32>
    %15 = vector.broadcast %6 : vector<1x128xf32> to vector<8x128xf32>
    %16 = arith.addf %14, %15 : vector<8x128xf32>
    %cst_12 = arith.constant 0.000000e+00 : f32
    %17 = vector.broadcast %cst_12 : f32 to vector<8x128xf32>
    %18 = arith.maximumf %16, %17 : vector<8x128xf32>
    %cst_13 = arith.constant dense<0.000000e+00> : vector<8x128xf32>
    %19 = tpu.matmul %18, %3, %cst_13 {dimension_numbers = #tpu.dot_dimension_numbers<[1], [0], [0], [1], [0, 0, 1, 1], [], []>} : vector<8x128xf32>, vector<128x128xf32>, vector<8x128xf32> -> vector<8x128xf32>
    %20 = vector.broadcast %7 : vector<1x128xf32> to vector<8x128xf32>
    %21 = arith.addf %19, %20 : vector<8x128xf32>
    %cst_14 = arith.constant 0.000000e+00 : f32
    %22 = vector.broadcast %cst_14 : f32 to vector<8x128xf32>
    %23 = arith.maximumf %21, %22 : vector<8x128xf32>
    %cst_15 = arith.constant dense<0.000000e+00> : vector<8x128xf32>
    %24 = tpu.matmul %23, %4, %cst_15 {dimension_numbers = #tpu.dot_dimension_numbers<[1], [0], [0], [1], [0, 0, 1, 1], [], []>} : vector<8x128xf32>, vector<128x128xf32>, vector<8x128xf32> -> vector<8x128xf32>
    %25 = vector.broadcast %8 : vector<1x128xf32> to vector<8x128xf32>
    %26 = arith.addf %24, %25 : vector<8x128xf32>
    %cst_16 = arith.constant dense<0xFF800000> : vector<8xf32>
    %27 = vector.multi_reduction <maximumf>, %26, %cst_16 [1] : vector<8x128xf32> to vector<8xf32>
    %28 = vector.shape_cast %27 : vector<8xf32> to vector<8x1xf32>
    %29 = vector.broadcast %28 : vector<8x1xf32> to vector<8x128xf32>
    %30 = arith.subf %26, %29 : vector<8x128xf32>
    %31 = math.exp %30 : vector<8x128xf32>
    %cst_17 = arith.constant dense<0.000000e+00> : vector<8xf32>
    %32 = vector.multi_reduction <add>, %31, %cst_17 [1] : vector<8x128xf32> to vector<8xf32>
    %33 = vector.shape_cast %32 : vector<8xf32> to vector<8x1xf32>
    %34 = vector.broadcast %33 : vector<8x1xf32> to vector<8x128xf32>
    %35 = arith.divf %31, %34 : vector<8x128xf32>
    %c0_18 = arith.constant 0 : index
    %c0_19 = arith.constant 0 : index
    %36 = vector.load %arg3[%c0_18, %c0_19] : memref<8x128xf32, #tpu.memory_space<vmem>>, vector<8x128xf32>
    tpu.vector_store %arg3[%c0_18, %c0_19], %35 {strides = array<i32>} : memref<8x128xf32, #tpu.memory_space<vmem>>, vector<8x128xf32>,
    return
  }
  func.func @transform_0(%arg0: i32) -> (i32, i32) {
    %c0_i32 = arith.constant 0 : i32
    %c0_i32_0 = arith.constant 0 : i32
    return %arg0, %c0_i32 : i32, i32
  }
  func.func @transform_1(%arg0: i32) -> (i32, i32) {
    %c0_i32 = arith.constant 0 : i32
    %c0_i32_0 = arith.constant 0 : i32
    %c0_i32_1 = arith.constant 0 : i32
    return %c0_i32, %c0_i32_0 : i32, i32
  }
  func.func @transform_2(%arg0: i32) -> (i32, i32) {
    %c0_i32 = arith.constant 0 : i32
    %c0_i32_0 = arith.constant 0 : i32
    return %arg0, %c0_i32 : i32, i32
  }
}

</mosaic_0001>

<bundles_post_ra>
// kernel: tpu_custom_call.1
= control target key start
LH: loop header
LB: loop body
LE: loop exit
PB: predicated region body
PF: predicated region fallthrough
CT: control target
= control target key end

     0   :  { %7 = vsyncpa [#allocation3], 0  ;;  %s349_s0 = inlined_call_operand.hbm [shape: f32[8,8], index: 0, kind: input, shape index: {}]   ;;  %s350_s1 = inlined_call_operand.hbm [shape: f32[400,128], index: 1, kind: input, shape index: {}]   ;;  %s351_s2 = inlined_call_operand.hbm [shape: f32[8,128], index: 2, kind: output, shape index: {}]  }
   0x1   :  { %8 = vsyncpa [#allocation6], 0 }
   0x2   :  { %9 = vsyncpa [#allocation4], 0  ;;  %s15_s11 = sshll.u32 %s349_s0, 4  ;;  %s320_s12 = smov [#allocation2]   ;;  %s16_s11 = int_to_ptr.hbm [resolvable:$true] %s15_s11 }
   0x3   :  { %s17_s13 = sshll.u32 %s320_s12, 4  ;;  %s25_s16 = sshll.u32 %s350_s1, 4  ;;  %s18_s13 = int_to_ptr.vmem [resolvable:$true] %s17_s13  ;;  %s26_s16 = int_to_ptr.hbm [resolvable:$true] %s25_s16 }
   0x4   :  { %20 = dma.hbm_to_vmem [thread:$0]  %s16_s11, 128, %s18_s13, [#allocation3]  }
   0x5   :  { %s321_s17 = smov [#allocation5]   ;;  %s322_s19 = smov 128  }
   0x6   :  { %s27_s18 = sshll.u32 %s321_s17, 4  ;;  %s323_s20 = smov 8   ;;  %s28_s18 = int_to_ptr.vmem [resolvable:$true] %s27_s18 }
   0x7   :  { %33 = dma.hbm_to_vmem [thread:$0]  %s26_s16, 6400, %s28_s18, [#allocation6], %s322_s19, %s322_s19, %s323_s20  }
   0x8   :  { %314 = dma.done.wait [#allocation3], 128  }
   0x9   :  { %315 = vsyncadd [#allocation3], 4294967168 }
   0xa   :  { %316 = dma.done.wait [#allocation6], 6400  }
   0xb   :  { %317 = vsyncadd [#allocation6], 4294960896  ;;  %vm97_vm0 = vcmask 64512   ;;  %v43_v0 = vld [vmem:[#allocation5] sm:$0xff]  ;;  %v42_v1 = vld [vmem:[#allocation2] sm:$0xff]  ;;  %s324_s0 = smov [#allocation7]  }
   0xc   :  { %v59_v2 = vld [vmem:[#allocation5 + $0x80] sm:$0xff]  ;;  %116 = vmatpush.msra.mxu0 %v43_v0  ;;  %v58_v3 = vld [vmem:[#allocation5 + $0x78] sm:$0xff]  ;;  %v57_v4 = vld [vmem:[#allocation5 + $0x70] sm:$0xff]  ;;  %s215_s1 = sshll.u32 %s324_s0, 4  ;;  %s217_s23 = sshll.u32 %s351_s2, 4  ;;  %s216_s1 = int_to_ptr.vmem [resolvable:$true] %s215_s1  ;;  %s218_s23 = int_to_ptr.hbm [resolvable:$true] %s217_s23 }
   0xd   :  { %123 = vmatpush.msra.mxu1 %v59_v2  ;;  %228 = vmatmul.msk.f32.vlgmr.msra.gmra.mxu0 %vm97_vm0, %v42_v1  ;;  %v56_v5 = vld [vmem:[#allocation5 + $0x68] sm:$0xff]  ;;  %v55_v6 = vld [vmem:[#allocation5 + $0x60] sm:$0xff]  ;;  %v54_v7 = vld [vmem:[#allocation5 + $0x58] sm:$0xff] }
   0xe   :  { %v53_v8 = vld [vmem:[#allocation5 + $0x50] sm:$0xff]  ;;  %v52_v9 = vld [vmem:[#allocation5 + $0x48] sm:$0xff]  ;;  %v51_v10 = vld [vmem:[#allocation5 + $0x40] sm:$0xff] }
   0xf   :  { %124 = vmatpush.msra.mxu1 %v58_v3  ;;  %v50_v11 = vld [vmem:[#allocation5 + $0x38] sm:$0xff]  ;;  %v49_v12 = vld [vmem:[#allocation5 + $0x30] sm:$0xff]  ;;  %v48_v13 = vld [vmem:[#allocation5 + $0x28] sm:$0xff] }
  0x10   :  { %v47_v14 = vld [vmem:[#allocation5 + $0x20] sm:$0xff]  ;;  %v46_v15 = vld [vmem:[#allocation5 + $0x18] sm:$0xff]  ;;  %v45_v16 = vld [vmem:[#allocation5 + $0x10] sm:$0xff] }
  0x11   :  { %125 = vmatpush.msra.mxu1 %v57_v4  ;;  %v44_v17 = vld [vmem:[#allocation5 + $0x8] sm:$0xff]  ;;  %v75_v18 = vld [vmem:[#allocation5 + $0x100] sm:$0xff]  ;;  %v74_v19 = vld [vmem:[#allocation5 + $0xf8] sm:$0xff] }
  0x12   :  { %145 = vmatpush.msra.mxu2 %v75_v18  ;;  %v73_v20 = vld [vmem:[#allocation5 + $0xf0] sm:$0xff]  ;;  %v72_v21 = vld [vmem:[#allocation5 + $0xe8] sm:$0xff]  ;;  %v71_v22 = vld [vmem:[#allocation5 + $0xe0] sm:$0xff] }
  0x13   :  { %126 = vmatpush.msra.mxu1 %v56_v5  ;;  %v70_v23 = vld [vmem:[#allocation5 + $0xd8] sm:$0xff]  ;;  %v69_v24 = vld [vmem:[#allocation5 + $0xd0] sm:$0xff]  ;;  %v68_v25 = vld [vmem:[#allocation5 + $0xc8] sm:$0xff] }
  0x14   :  { %146 = vmatpush.msra.mxu2 %v74_v19  ;;  %v67_v26 = vld [vmem:[#allocation5 + $0xc0] sm:$0xff]  ;;  %v66_v27 = vld [vmem:[#allocation5 + $0xb8] sm:$0xff]  ;;  %v65_v28 = vld [vmem:[#allocation5 + $0xb0] sm:$0xff] }
  0x15   :  { %127 = vmatpush.msra.mxu1 %v55_v6  ;;  %v64_v29 = vld [vmem:[#allocation5 + $0xa8] sm:$0xff]  ;;  %v63_v30 = vld [vmem:[#allocation5 + $0xa0] sm:$0xff]  ;;  %v62_v35 = vld [vmem:[#allocation5 + $0x98] sm:$0xff] }
  0x16   :  { %147 = vmatpush.msra.mxu2 %v73_v20  ;;  %v234_v31 = vld [vmem:[#allocation5 + $0x188] ss:$0 sm:$0xff]  ;;  %v61_v36 = vld [vmem:[#allocation5 + $0x90] sm:$0xff]  ;;  %v91_v38 = vld [vmem:[#allocation5 + $0x180] sm:$0xff] }
  0x17   :  { %128 = vmatpush.msra.mxu1 %v54_v7  ;;  %v60_v37 = vld [vmem:[#allocation5 + $0x88] sm:$0xff]  ;;  %v90_v39 = vld [vmem:[#allocation5 + $0x178] sm:$0xff]  ;;  %167 = vmatpush.msra.mxu3 %v91_v38  ;;  %v89_v40 = vld [vmem:[#allocation5 + $0x170] sm:$0xff] }
  0x18   :  { %148 = vmatpush.msra.mxu2 %v72_v21  ;;  %v88_v41 = vld [vmem:[#allocation5 + $0x168] sm:$0xff]  ;;  %v87_v42 = vld [vmem:[#allocation5 + $0x160] sm:$0xff]  ;;  %v86_v43 = vld [vmem:[#allocation5 + $0x158] sm:$0xff] }
  0x19   :  { %129 = vmatpush.msra.mxu1 %v53_v8  ;;  %168 = vmatpush.msra.mxu3 %v90_v39  ;;  %v85_v44 = vld [vmem:[#allocation5 + $0x150] sm:$0xff]  ;;  %v84_v45 = vld [vmem:[#allocation5 + $0x148] sm:$0xff]  ;;  %v83_v46 = vld [vmem:[#allocation5 + $0x140] sm:$0xff] }
  0x1a   :  { %149 = vmatpush.msra.mxu2 %v71_v22  ;;  %v82_v47 = vld [vmem:[#allocation5 + $0x138] sm:$0xff]  ;;  %v81_v48 = vld [vmem:[#allocation5 + $0x130] sm:$0xff]  ;;  %v80_v49 = vld [vmem:[#allocation5 + $0x128] sm:$0xff] }
  0x1b   :  { %130 = vmatpush.msra.mxu1 %v52_v9  ;;  %169 = vmatpush.msra.mxu3 %v89_v40  ;;  %v79_v50 = vld [vmem:[#allocation5 + $0x120] sm:$0xff]  ;;  %v235_v51 = vld [vmem:[#allocation5 + $0x189] ss:$0 sm:$0xff]  ;;  %v78_v55 = vld [vmem:[#allocation5 + $0x118] sm:$0xff] }
  0x1c   :  { %150 = vmatpush.msra.mxu2 %v70_v23  ;;  %v77_v56 = vld [vmem:[#allocation5 + $0x110] sm:$0xff]  ;;  %v76_v57 = vld [vmem:[#allocation5 + $0x108] sm:$0xff] }
  0x1d   :  { %131 = vmatpush.msra.mxu1 %v51_v10  ;;  %170 = vmatpush.msra.mxu3 %v88_v41  ;;  %v236_v58 = vld [vmem:[#allocation5 + $0x18a] ss:$0 sm:$0xff]  ;;  %v237_v62 = vld [vmem:[#allocation5 + $0x18b] ss:$0 sm:$0xff] }
  0x1e   :  { %151 = vmatpush.msra.mxu2 %v69_v24 }
  0x1f   :  { %132 = vmatpush.msra.mxu1 %v50_v11  ;;  %171 = vmatpush.msra.mxu3 %v87_v42 }
  0x20   :  { %152 = vmatpush.msra.mxu2 %v68_v25 }
  0x21   :  { %133 = vmatpush.msra.mxu1 %v49_v12  ;;  %172 = vmatpush.msra.mxu3 %v86_v43 }
  0x22   :  { %153 = vmatpush.msra.mxu2 %v67_v26 }
  0x23   :  { %134 = vmatpush.msra.mxu1 %v48_v13  ;;  %173 = vmatpush.msra.mxu3 %v85_v44 }
  0x24   :  { %154 = vmatpush.msra.mxu2 %v66_v27 }
  0x25   :  { %135 = vmatpush.msra.mxu1 %v47_v14  ;;  %174 = vmatpush.msra.mxu3 %v84_v45 }
  0x26   :  { %155 = vmatpush.msra.mxu2 %v65_v28 }
  0x27   :  { %136 = vmatpush.msra.mxu1 %v46_v15  ;;  %175 = vmatpush.msra.mxu3 %v83_v46 }
  0x28   :  { %156 = vmatpush.msra.mxu2 %v64_v29 }
  0x29   :  { %137 = vmatpush.msra.mxu1 %v45_v16  ;;  %176 = vmatpush.msra.mxu3 %v82_v47 }
  0x2a   :  { %157 = vmatpush.msra.mxu2 %v63_v30 }
  0x2b   :  { %138 = vmatpush.msra.mxu1 %v44_v17  ;;  %177 = vmatpush.msra.mxu3 %v81_v48 }
  0x2c   :  { %158 = vmatpush.msra.mxu2 %v62_v35 }
  0x2d   :  { %178 = vmatpush.msra.mxu3 %v80_v49 }
  0x2e   :  { %159 = vmatpush.msra.mxu2 %v61_v36 }
  0x2f   :  { %179 = vmatpush.msra.mxu3 %v79_v50 }
  0x30   :  { %160 = vmatpush.msra.mxu2 %v60_v37 }
  0x31   :  { %180 = vmatpush.msra.mxu3 %v78_v55 }
  0x33   :  { %181 = vmatpush.msra.mxu3 %v77_v56 }
  0x35   :  { %182 = vmatpush.msra.mxu3 %v76_v57 }
  0x8a   :  { %v118_v32 = vpop.f32.mrf.mxu0 }
  0x8b   :  { %v119_v33 = vadd.f32 %v234_v31, %v118_v32 }
  0x8d   :  { %v121_v34 = vmax.f32 %v119_v33, 0.0 }
  0x8f   :  { %139 = vmatmul.f32.vlgmr.msra.gmra.mxu1 %v121_v34 }
 0x10c   :  { %v140_v52 = vpop.f32.mrf.mxu1 }
 0x10d   :  { %v141_v53 = vadd.f32 %v235_v51, %v140_v52 }
 0x10f   :  { %v143_v54 = vmax.f32 %v141_v53, 0.0 }
 0x111   :  { %161 = vmatmul.f32.vlgmr.msra.gmra.mxu2 %v143_v54 }
 0x194   :  { %v162_v59 = vpop.f32.mrf.mxu2 }
 0x195   :  { %v163_v60 = vadd.f32 %v236_v58, %v162_v59 }
 0x197   :  { %v165_v61 = vmax.f32 %v163_v60, 0.0 }
 0x199   :  { %183 = vmatmul.f32.vlgmr.msra.gmra.mxu3 %v165_v61 }
 0x21c   :  { %v184_v63 = vpop.f32.mrf.mxu3 }
 0x21d   :  { %v185_v0 = vadd.f32 %v237_v62, %v184_v63 }
 0x21f   :  { %187 = vmax.xlane.f32.xlu0 %v185_v0 }
 0x292   :  { %v188_v1 = vpop.xlane.xlu0 %187 }
 0x293   :  { %v189_v2 = vsub.f32 %v185_v0, %v188_v1 }
 0x295   :  { %v190_v3 = vmul.f32 1.442695, %v189_v2 }
 0x297   :  { %238 = vpow2.f32 %v190_v3 }
 0x29d   :  { %v239_v4 = vpop.eup %238 }
 0x29e   :  { %192 = vadd.xlane.f32.xlu0 %v239_v4 }
 0x311   :  { %v193_v5 = vpop.xlane.xlu0 %192 }
 0x312   :  { %240 = vrcp.f32 %v193_v5  ;;  %v205_v9 = vand.u32 2147483648, %v193_v5  ;;  %v203_v11 = vand.u32 2147483647, %v193_v5  ;;  %vm199_vm2 = vweird.f32 %v193_v5 }
 0x314   :  { %v206_v13 = vor.u32 1.1754944e-38, %v205_v9  ;;  %vm204_vm4 = vcmp.eq.f32.partialorder %v203_v11, 8.507059e+37 }
 0x318   :  { %v241_v6 = vpop.eup %240 }
 0x319   :  { %v195_v7 = vmul.f32 %v241_v6, %v193_v5  ;;  %vm200_vm1 = vweird.f32 %v241_v6 }
 0x31a   :  { %vm201_vm3 = vmor %vm199_vm2, %vm200_vm1 }
 0x31b   :  { %v196_v8 = vsub.f32 1.0, %v195_v7 }
 0x31d   :  { %v197_v10 = vmul.f32 %v241_v6, %v196_v8 }
 0x31f   :  { %v198_v12 = vadd.f32 %v241_v6, %v197_v10 }
 0x321   :  { %v202_v14 = vsel %vm201_vm3, %v241_v6, %v198_v12 }
 0x322   :  { %v207_v15 = vsel %vm204_vm4, %v206_v13, %v202_v14 }
 0x323   :  { %v208_v16 = vmul.f32 %v239_v4, %v207_v15 }
 0x325   :  { %209 = vst [vmem:[#allocation7] sm:$0xff] %v208_v16 }
 0x326   :  { %220 = dma.vmem_to_hbm [thread:$0]  %s216_s1, 128, %s218_s23, [#allocation4]  }
 0x327   :  { %318 = dma.done.wait [#allocation4], 128  }
 0x328   :  { %319 = vsyncadd [#allocation4], 4294967168 }
 0x329   :  { %225 = vsyncpa [#allocation3], 1 }
 0x32a   :  { %226 = vsyncpa [#allocation6], 1 }
 0x32b   :  { %227 = vsyncpa [#allocation4], 1 }

</bundles_post_ra>
